<compile_context>
chip_gen: v7x
topology: tpu7x:2x2x1
jax: 0.10.0
libtpu: 0.0.40
codegen_flags: <defaults>
</compile_context>

<pallas_src>
import jax
import jax.numpy as jnp
from jax import lax
from jax.experimental import pallas as pl
from jax.experimental.pallas import tpu as pltpu

LATENT = 512
HIDDEN = LATENT // 4   # 128
OUT = 2


def _round_up(x, m):
    return -(-x // m) * m


def net_attr_kernel(z_ref, w1_ref, w2_ref, o_ref):
    # matmul -> relu -> matmul, all in VMEM, f32 accumulation on the MXU.
    # Weights are in PyTorch (out, in) layout, so contract on the LAST dim of
    # both operands (the A @ W^T form, natively supported by the MXU).
    z = z_ref[...].astype(jnp.float32)          # in-VMEM upcast if z is bf16
    h = lax.dot_general(
        z, w1_ref[...],
        dimension_numbers=(((1,), (1,)), ((), ())),
        preferred_element_type=jnp.float32,
    )                                           # (tile_b, 128)
    h = jnp.maximum(h, 0.0)
    y = lax.dot_general(
        h, w2_ref[...],
        dimension_numbers=(((1,), (1,)), ((), ())),
        preferred_element_type=jnp.float32,
    )                                           # (tile_b, 2)
    o_ref[...] = y.astype(o_ref.dtype)


def net_attr_forward(z, w1, w2, *, tile_b=2048):
    """z: (B, 512) f32 or bf16; w1: (128, 512); w2: (2, 128) [PyTorch (out,in)].

    Returns (B, 2) float32.  z is streamed from HBM in its given dtype (pass
    bf16 activations upstream if you want the halved z read); weights stay f32.
    """
    B = z.shape[0]
    w1 = w1.astype(jnp.float32)
    w2 = w2.astype(jnp.float32)

    # Cap the tile to the 8-rounded batch so tiny batches don't over-allocate.
    tile_b = max(8, min(int(tile_b), _round_up(B, 8)))
    # v7x megacore: prefer >= 2 grid tiles when the batch is big enough to
    # split (no-op on v5e/v6e, harmless everywhere).
    if B >= 16 and pl.cdiv(B, tile_b) < 2:
        tile_b = max(8, _round_up(-(-B // 2), 8))
    num_tiles = pl.cdiv(B, tile_b)

    z_itemsize = jnp.dtype(z.dtype).itemsize
    cost = pl.CostEstimate(
        flops=2 * B * LATENT * HIDDEN + 2 * B * HIDDEN * OUT,
        transcendentals=0,
        bytes_accessed=(B * LATENT * z_itemsize      # z read (dominant)
                        + HIDDEN * LATENT * 4        # W1 read (once)
                        + OUT * HIDDEN * 4           # W2 read (once)
                        + B * OUT * 4),              # narrow output write
    )

    out = pl.pallas_call(
        net_attr_kernel,
        out_shape=jax.ShapeDtypeStruct((B, OUT), jnp.float32),
        grid_spec=pltpu.PrefetchScalarGridSpec(
            num_scalar_prefetch=0,
            grid=(num_tiles,),
            in_specs=[
                pl.BlockSpec((tile_b, LATENT), lambda i: (i, 0)),  # z (streamed)
                pl.BlockSpec((HIDDEN, LATENT), lambda i: (0, 0)),  # W1 (resident)
                pl.BlockSpec((OUT, HIDDEN), lambda i: (0, 0)),     # W2 (resident)
            ],
            out_specs=pl.BlockSpec((tile_b, OUT), lambda i: (i, 0)),
        ),
        compiler_params=pltpu.CompilerParams(
            dimension_semantics=("parallel",),
        ),
        cost_estimate=cost,
    )(z, w1, w2)

    return out


def reference_forward(z, w1, w2):
    h = jnp.maximum(z.astype(jnp.float32) @ w1.T, 0.0)
    return h @ w2.T


if __name__ == "__main__":
    key = jax.random.PRNGKey(0)
    k_z, k_w1, k_w2 = jax.random.split(key, 3)

    # Deterministic weight init (kaiming-uniform-like scale, as nn.Linear uses).
    bound1 = 1.0 / (LATENT ** 0.5)
    bound2 = 1.0 / (HIDDEN ** 0.5)
    w1 = jax.random.uniform(k_w1, (HIDDEN, LATENT), jnp.float32, -bound1, bound1)
    w2 = jax.random.uniform(k_w2, (OUT, HIDDEN), jnp.float32, -bound2, bound2)

    # 1) f32 path, small batch: exact parity with the PyTorch module.
    B = 8
    z = jax.random.normal(k_z, (B, LATENT), dtype=jnp.float32)
    out = jax.block_until_ready(net_attr_forward(z, w1, w2))
    assert out.shape == (B, OUT)
    assert jnp.allclose(out, reference_forward(z, w1, w2), atol=1e-4, rtol=1e-4)

    # 2) Ragged batch (B not a multiple of the tile): masked edge blocks,
    #    no host-side padding copy.
    z_ragged = jax.random.normal(k_z, (13, LATENT), dtype=jnp.float32)
    out_r = jax.block_until_ready(net_attr_forward(z_ragged, w1, w2, tile_b=8))
    assert out_r.shape == (13, OUT)
    assert jnp.allclose(out_r, reference_forward(z_ragged, w1, w2),
                        atol=1e-4, rtol=1e-4)

    # 3) Multi-tile batch (exercises the >=2-tile megacore split).
    z_big = jax.random.normal(k_z, (48, LATENT), dtype=jnp.float32)
    out_big = jax.block_until_ready(net_attr_forward(z_big, w1, w2))
    assert out_big.shape == (48, OUT)
    assert jnp.allclose(out_big, reference_forward(z_big, w1, w2),
                        atol=1e-4, rtol=1e-4)

    # 4) bf16 activations supplied upstream (no wrapper-side convert):
    #    deliberate precision trade for the halved z read.
    z_bf16 = jax.random.normal(k_z, (16, LATENT), dtype=jnp.float32).astype(jnp.bfloat16)
    out_bf = jax.block_until_ready(net_attr_forward(z_bf16, w1, w2))
    assert out_bf.shape == (16, OUT)
    assert jnp.allclose(out_bf, reference_forward(z_bf16, w1, w2),
                        atol=2e-2, rtol=2e-2)

    print("KERNEL_OK")
</pallas_src>

<mosaic_0001>
module attributes {stable_mosaic.version = 11 : i64} {
  func.func @net_attr_kernel(%arg0: i32, %arg1: memref<8x512xf32, #tpu.memory_space<vmem>>, %arg2: memref<128x512xf32, #tpu.memory_space<vmem>>, %arg3: memref<2x128xf32, #tpu.memory_space<vmem>>, %arg4: memref<8x2xf32, #tpu.memory_space<vmem>>) attributes {dimension_semantics = [#tpu.dimension_semantics<parallel>], iteration_bounds = array<i64: 1>, scalar_prefetch = 0 : i64, scratch_operands = 0 : i64, tpu.core_type = #tpu.core_type<tc>, window_params = [{transform_indices = @transform_0, window_bounds = array<i64: 8, 512>}, {pipeline_mode = #tpu.pipeline_mode<synchronous>, transform_indices = @transform_1, window_bounds = array<i64: 128, 512>}, {pipeline_mode = #tpu.pipeline_mode<synchronous>, transform_indices = @transform_2, window_bounds = array<i64: 2, 128>}, {transform_indices = @transform_3, window_bounds = array<i64: 8, 2>}]} {
    %c0 = arith.constant 0 : index
    %c0_0 = arith.constant 0 : index
    %0 = vector.load %arg1[%c0, %c0_0] : memref<8x512xf32, #tpu.memory_space<vmem>>, vector<8x512xf32>
    %c0_1 = arith.constant 0 : index
    %c0_2 = arith.constant 0 : index
    %1 = vector.load %arg2[%c0_1, %c0_2] : memref<128x512xf32, #tpu.memory_space<vmem>>, vector<128x512xf32>
    %cst = arith.constant dense<0.000000e+00> : vector<8x128xf32>
    %2 = tpu.matmul %0, %1, %cst {dimension_numbers = #tpu.dot_dimension_numbers<[1], [1], [0], [0], [0, 0, 1, 0], [], []>} : vector<8x512xf32>, vector<128x512xf32>, vector<8x128xf32> -> vector<8x128xf32>
    %cst_3 = arith.constant 0.000000e+00 : f32
    %3 = vector.broadcast %cst_3 : f32 to vector<8x128xf32>
    %4 = arith.maximumf %2, %3 : vector<8x128xf32>
    %c0_4 = arith.constant 0 : index
    %c0_5 = arith.constant 0 : index
    %5 = vector.load %arg3[%c0_4, %c0_5] : memref<2x128xf32, #tpu.memory_space<vmem>>, vector<2x128xf32>
    %cst_6 = arith.constant dense<0.000000e+00> : vector<8x2xf32>
    %6 = tpu.matmul %4, %5, %cst_6 {dimension_numbers = #tpu.dot_dimension_numbers<[1], [1], [0], [0], [0, 0, 1, 0], [], []>} : vector<8x128xf32>, vector<2x128xf32>, vector<8x2xf32> -> vector<8x2xf32>
    %c0_7 = arith.constant 0 : index
    %c0_8 = arith.constant 0 : index
    %7 = vector.load %arg4[%c0_7, %c0_8] : memref<8x2xf32, #tpu.memory_space<vmem>>, vector<8x2xf32>
    tpu.vector_store %arg4[%c0_7, %c0_8], %6 {strides = array<i32>} : memref<8x2xf32, #tpu.memory_space<vmem>>, vector<8x2xf32>,
    return
  }
  func.func @transform_0(%arg0: i32) -> (i32, i32) {
    %c0_i32 = arith.constant 0 : i32
    %c0_i32_0 = arith.constant 0 : i32
    return %arg0, %c0_i32 : i32, i32
  }
  func.func @transform_1(%arg0: i32) -> (i32, i32) {
    %c0_i32 = arith.constant 0 : i32
    %c0_i32_0 = arith.constant 0 : i32
    %c0_i32_1 = arith.constant 0 : i32
    return %c0_i32, %c0_i32_0 : i32, i32
  }
  func.func @transform_2(%arg0: i32) -> (i32, i32) {
    %c0_i32 = arith.constant 0 : i32
    %c0_i32_0 = arith.constant 0 : i32
    %c0_i32_1 = arith.constant 0 : i32
    return %c0_i32, %c0_i32_0 : i32, i32
  }
  func.func @transform_3(%arg0: i32) -> (i32, i32) {
    %c0_i32 = arith.constant 0 : i32
    %c0_i32_0 = arith.constant 0 : i32
    return %arg0, %c0_i32 : i32, i32
  }
}

</mosaic_0001>

<bundles_post_ra>
// kernel: tpu_custom_call.1
= control target key start
LH: loop header
LB: loop body
LE: loop exit
PB: predicated region body
PF: predicated region fallthrough
CT: control target
= control target key end

     0   :  { %8 = vsyncpa [#allocation3], 0  ;;  %s517_s0 = inlined_call_operand.hbm [shape: f32[8,512], index: 0, kind: input, shape index: {}]   ;;  %s518_s1 = inlined_call_operand.hbm [shape: f32[128,512], index: 1, kind: input, shape index: {}]   ;;  %s519_s2 = inlined_call_operand.vmem [shape: f32[2,128], index: 2, kind: input, shape index: {}]   ;;  %s520_s3 = inlined_call_operand.vmem [shape: f32[8,2], index: 3, kind: output, shape index: {}]  }
   0x1   :  { %9 = vsyncpa [#allocation5], 0  ;;  %s454_s12 = smov [#allocation2]   ;;  %s455_s14 = smov [#allocation4]  }
   0x2   :  { %s16_s13 = sshll.u32 %s454_s12, 4  ;;  %s25_s15 = sshll.u32 %s455_s14, 4  ;;  %s17_s13 = int_to_ptr.vmem [resolvable:$true] %s16_s13  ;;  %s480_s15 = int_to_ptr.vmem [resolvable:$true] %s25_s15 }
   0x3   :  { %s406_s18 = scalar_lea.hbm %s517_s0, 512 }
   0x4   :  { %p407_p0 = scmp.ne.s32.totalorder %s517_s0, %s406_s18  ;;  %p410_p1 = scmp.lt.u32.totalorder %s406_s18, %s517_s0 }
   0x6   :  { %p412_p2 = pnand %p410_p1, %p407_p0 }
   0x8   :  { %415 = shalt.err (!%p412_p2)
}
   0x9   :  { %s416_s23 = scalar_lea.vmem %s17_s13, 512  ;;  %p421_p4 = scmp.lt.s32.totalorder %s17_s13, %s17_s13 }
   0xa   :  { %p417_p3 = scmp.ne.s32.totalorder %s17_s13, %s416_s23  ;;  %p422_p5 = scmp.lt.s32.totalorder %s416_s23, %s416_s23 }
   0xc   :  { %p423_p6 = por %p422_p5, %p421_p4 }
   0xe   :  { %p424_p7 = pnand %p423_p6, %p417_p3 }
  0x10   :  { %427 = shalt.err (!%p424_p7)
}
  0x11   :  { %19 = dma.hbm_to_vmem [thread:$0]  %s517_s0, 512, %s17_s13, [#allocation3]  }
  0x12   :  { %s428_s28 = scalar_lea.hbm %s518_s1, 8192 }
  0x13   :  { %p429_p8 = scmp.ne.s32.totalorder %s518_s1, %s428_s28  ;;  %p432_p9 = scmp.lt.u32.totalorder %s428_s28, %s518_s1 }
  0x15   :  { %p434_p10 = pnand %p432_p9, %p429_p8 }
  0x17   :  { %437 = shalt.err (!%p434_p10)
}
  0x18   :  { %s438_s6 = scalar_lea.vmem %s480_s15, 8192  ;;  %p443_p12 = scmp.lt.s32.totalorder %s480_s15, %s480_s15 }
  0x19   :  { %p439_p11 = scmp.ne.s32.totalorder %s480_s15, %s438_s6  ;;  %p444_p13 = scmp.lt.s32.totalorder %s438_s6, %s438_s6 }
  0x1b   :  { %p445_p0 = por %p444_p13, %p443_p12 }
  0x1d   :  { %p446_p1 = pnand %p445_p0, %p439_p11 }
  0x1f   :  { %449 = shalt.err (!%p446_p1)
}
  0x20   :  { %s456_s0 = smov 512   ;;  %s457_s7 = smov 32  }
  0x21   :  { %31 = dma.hbm_to_vmem [thread:$0]  %s518_s1, 8192, %s480_s15, [#allocation5], %s456_s0, %s456_s0, %s457_s7  }
  0x22   :  { %450 = dma.done.wait [#allocation3], 512  }
  0x23   :  { %451 = vsyncadd [#allocation3], 4294966784 }
  0x24   :  { %452 = dma.done.wait [#allocation5], 8192  }
  0x25   :  { %453 = vsyncadd [#allocation5], 4294959104  ;;  %v45_v0 = vld [vmem:[#allocation4 + $0x8] sm:$0xff]  ;;  %v47_v2 = vld [vmem:[#allocation4 + $0x18] sm:$0xff]  ;;  %vm459_vm0 = vmmov 0   ;;  %vm320_vm1 = vcmask 15360  }
  0x26   :  { %v49_v1 = vld [vmem:[#allocation4 + $0x28] sm:$0xff]  ;;  %v51_v4 = vld [vmem:[#allocation4 + $0x38] sm:$0xff]  ;;  %v44_v5 = vld [vmem:[#allocation4] sm:$0xff] }
  0x27   :  { %v335_v3 = vpack.c.bf16 %v49_v1, %v45_v0  ;;  %v48_v6 = vld [vmem:[#allocation4 + $0x20] sm:$0xff]  ;;  %v367_v7 = vpack.c.bf16 %v51_v4, %v47_v2  ;;  %v46_v9 = vld [vmem:[#allocation4 + $0x10] sm:$0xff]  ;;  %v53_v11 = vld [vmem:[#allocation4 + $0x48] sm:$0xff] }
  0x28   :  { %v337_v8 = vpack.c.bf16 %v48_v6, %v44_v5  ;;  %v50_v10 = vld [vmem:[#allocation4 + $0x30] sm:$0xff]  ;;  %v57_v13 = vld [vmem:[#allocation4 + $0x68] sm:$0xff]  ;;  %v55_v14 = vld [vmem:[#allocation4 + $0x58] sm:$0xff] }
  0x29   :  { %336 = vmatprep.subr.bf16.mxu1 %v335_v3  ;;  %v369_v12 = vpack.c.bf16 %v50_v10, %v46_v9  ;;  %v59_v15 = vld [vmem:[#allocation4 + $0x78] sm:$0xff]  ;;  %368 = vmatprep.subr.bf16.mxu0 %v367_v7  ;;  %v339_v16 = vpack.c.bf16 %v57_v13, %v53_v11  ;;  %v52_v18 = vld [vmem:[#allocation4 + $0x40] sm:$0xff]  ;;  %v54_v20 = vld [vmem:[#allocation4 + $0x50] sm:$0xff] }
  0x2a   :  { %338 = vmatpush1.bf16.xpose.msra.mxu1 %v337_v8  ;;  %v371_v17 = vpack.c.bf16 %v59_v15, %v55_v14  ;;  %v56_v19 = vld [vmem:[#allocation4 + $0x60] sm:$0xff]  ;;  %v58_v21 = vld [vmem:[#allocation4 + $0x70] sm:$0xff]  ;;  %v61_v22 = vld [vmem:[#allocation4 + $0x88] sm:$0xff] }
  0x2b   :  { %370 = vmatpush1.bf16.xpose.msra.mxu0 %v369_v12  ;;  %340 = vmatprep.subr.bf16.mxu1 %v339_v16  ;;  %v65_v23 = vld [vmem:[#allocation4 + $0xa8] sm:$0xff]  ;;  %v63_v24 = vld [vmem:[#allocation4 + $0x98] sm:$0xff]  ;;  %v341_v26 = vpack.c.bf16 %v56_v19, %v52_v18  ;;  %v373_v27 = vpack.c.bf16 %v58_v21, %v54_v20  ;;  %v60_v30 = vld [vmem:[#allocation4 + $0x80] sm:$0xff] }
  0x2c   :  { %372 = vmatprep.subr.bf16.mxu0 %v371_v17  ;;  %v67_v25 = vld [vmem:[#allocation4 + $0xb8] sm:$0xff]  ;;  %v343_v28 = vpack.c.bf16 %v65_v23, %v61_v22  ;;  %v64_v31 = vld [vmem:[#allocation4 + $0xa0] sm:$0xff]  ;;  %v62_v32 = vld [vmem:[#allocation4 + $0x90] sm:$0xff] }
  0x2d   :  { %v375_v29 = vpack.c.bf16 %v67_v25, %v63_v24  ;;  %v66_v33 = vld [vmem:[#allocation4 + $0xb0] sm:$0xff]  ;;  %v69_v34 = vld [vmem:[#allocation4 + $0xc8] sm:$0xff]  ;;  %v71_v36 = vld [vmem:[#allocation4 + $0xd8] sm:$0xff]  ;;  %v345_v38 = vpack.c.bf16 %v64_v31, %v60_v30 }
  0x2e   :  { %v73_v35 = vld [vmem:[#allocation4 + $0xe8] sm:$0xff]  ;;  %v75_v37 = vld [vmem:[#allocation4 + $0xf8] sm:$0xff]  ;;  %v377_v39 = vpack.c.bf16 %v66_v33, %v62_v32  ;;  %v68_v42 = vld [vmem:[#allocation4 + $0xc0] sm:$0xff] }
  0x2f   :  { %v347_v40 = vpack.c.bf16 %v73_v35, %v69_v34  ;;  %v379_v41 = vpack.c.bf16 %v75_v37, %v71_v36  ;;  %v72_v43 = vld [vmem:[#allocation4 + $0xe0] sm:$0xff]  ;;  %v70_v44 = vld [vmem:[#allocation4 + $0xd0] sm:$0xff]  ;;  %v41_v45 = vld [vmem:[#allocation2 + $0x8] sm:$0xff]  ;;  %v458_v36 = vmov 0.0  }
  0x30   :  { %v43_v46 = vld [vmem:[#allocation2 + $0x18] sm:$0xff]  ;;  %v74_v47 = vld [vmem:[#allocation4 + $0xf0] sm:$0xff]  ;;  %v77_v48 = vld [vmem:[#allocation4 + $0x108] sm:$0xff]  ;;  %172 = vmatprep.mubr.f32.mxu1 %v41_v45  ;;  %v349_v52 = vpack.c.bf16 %v72_v43, %v68_v42 }
  0x31   :  { %v81_v49 = vld [vmem:[#allocation4 + $0x128] sm:$0xff]  ;;  %v79_v50 = vld [vmem:[#allocation4 + $0x118] sm:$0xff]  ;;  %242 = vmatprep.mubr.f32.mxu0 %v43_v46  ;;  %v381_v53 = vpack.c.bf16 %v74_v47, %v70_v44  ;;  %v76_v56 = vld [vmem:[#allocation4 + $0x100] sm:$0xff] }
  0x32   :  { %342 = vmatpush1.bf16.xpose.msra.mxu1 %v341_v26  ;;  %v83_v51 = vld [vmem:[#allocation4 + $0x138] sm:$0xff]  ;;  %v351_v54 = vpack.c.bf16 %v81_v49, %v77_v48  ;;  %v80_v57 = vld [vmem:[#allocation4 + $0x120] sm:$0xff]  ;;  %v78_v58 = vld [vmem:[#allocation4 + $0x110] sm:$0xff] }
  0x33   :  { %374 = vmatpush1.bf16.xpose.msra.mxu0 %v373_v27  ;;  %344 = vmatprep.subr.bf16.mxu1 %v343_v28  ;;  %v383_v55 = vpack.c.bf16 %v83_v51, %v79_v50  ;;  %v82_v59 = vld [vmem:[#allocation4 + $0x130] sm:$0xff]  ;;  %v85_v60 = vld [vmem:[#allocation4 + $0x148] sm:$0xff]  ;;  %v87_v62 = vld [vmem:[#allocation4 + $0x158] sm:$0xff]  ;;  %v353_v0 = vpack.c.bf16 %v80_v57, %v76_v56 }
  0x34   :  { %376 = vmatprep.subr.bf16.mxu0 %v375_v29  ;;  %v89_v61 = vld [vmem:[#allocation4 + $0x168] sm:$0xff]  ;;  %v91_v63 = vld [vmem:[#allocation4 + $0x178] sm:$0xff]  ;;  %v385_v1 = vpack.c.bf16 %v82_v59, %v78_v58  ;;  %v84_v4 = vld [vmem:[#allocation4 + $0x140] sm:$0xff] }
  0x35   :  { %v355_v2 = vpack.c.bf16 %v89_v61, %v85_v60  ;;  %v387_v3 = vpack.c.bf16 %v91_v63, %v87_v62  ;;  %v88_v5 = vld [vmem:[#allocation4 + $0x160] sm:$0xff]  ;;  %v86_v6 = vld [vmem:[#allocation4 + $0x150] sm:$0xff]  ;;  %v93_v8 = vld [vmem:[#allocation4 + $0x188] sm:$0xff] }
  0x36   :  { %v90_v7 = vld [vmem:[#allocation4 + $0x170] sm:$0xff]  ;;  %v97_v9 = vld [vmem:[#allocation4 + $0x1a8] sm:$0xff]  ;;  %v95_v10 = vld [vmem:[#allocation4 + $0x198] sm:$0xff]  ;;  %v357_v12 = vpack.c.bf16 %v88_v5, %v84_v4 }
  0x37   :  { %v99_v11 = vld [vmem:[#allocation4 + $0x1b8] sm:$0xff]  ;;  %v389_v13 = vpack.c.bf16 %v90_v7, %v86_v6  ;;  %v359_v14 = vpack.c.bf16 %v97_v9, %v93_v8  ;;  %v92_v16 = vld [vmem:[#allocation4 + $0x180] sm:$0xff]  ;;  %v94_v18 = vld [vmem:[#allocation4 + $0x190] sm:$0xff] }
  0x38   :  { %v391_v15 = vpack.c.bf16 %v99_v11, %v95_v10  ;;  %v96_v17 = vld [vmem:[#allocation4 + $0x1a0] sm:$0xff]  ;;  %v98_v19 = vld [vmem:[#allocation4 + $0x1b0] sm:$0xff]  ;;  %v101_v20 = vld [vmem:[#allocation4 + $0x1c8] sm:$0xff] }
  0x39   :  { %v105_v21 = vld [vmem:[#allocation4 + $0x1e8] sm:$0xff]  ;;  %v103_v22 = vld [vmem:[#allocation4 + $0x1d8] sm:$0xff]  ;;  %v361_v24 = vpack.c.bf16 %v96_v17, %v92_v16  ;;  %v393_v25 = vpack.c.bf16 %v98_v19, %v94_v18  ;;  %v100_v28 = vld [vmem:[#allocation4 + $0x1c0] sm:$0xff] }
  0x3a   :  { %346 = vmatpush1.bf16.xpose.msra.mxu1 %v345_v38  ;;  %v107_v23 = vld [vmem:[#allocation4 + $0x1f8] sm:$0xff]  ;;  %v363_v26 = vpack.c.bf16 %v105_v21, %v101_v20  ;;  %v104_v29 = vld [vmem:[#allocation4 + $0x1e0] sm:$0xff]  ;;  %v102_v30 = vld [vmem:[#allocation4 + $0x1d0] sm:$0xff] }
  0x3b   :  { %378 = vmatpush1.bf16.xpose.msra.mxu0 %v377_v39  ;;  %348 = vmatprep.subr.bf16.mxu1 %v347_v40  ;;  %v395_v27 = vpack.c.bf16 %v107_v23, %v103_v22  ;;  %v106_v31 = vld [vmem:[#allocation4 + $0x1f0] sm:$0xff]  ;;  %v365_v32 = vpack.c.bf16 %v104_v29, %v100_v28  ;;  %v40_v34 = vld [vmem:[#allocation2] sm:$0xff]  ;;  %v249_v37 = vld [vmem:[%s519_s2] sm:$0x3] }
  0x3c   :  { %380 = vmatprep.subr.bf16.mxu0 %v379_v41  ;;  %v397_v33 = vpack.c.bf16 %v106_v31, %v102_v30  ;;  %v42_v35 = vld [vmem:[#allocation2 + $0x10] sm:$0xff] }
  0x42   :  { %350 = vmatpush1.bf16.xpose.msra.mxu1 %v349_v52 }
  0x43   :  { %382 = vmatpush1.bf16.xpose.msra.mxu0 %v381_v53  ;;  %352 = vmatprep.subr.bf16.mxu1 %v351_v54 }
  0x44   :  { %384 = vmatprep.subr.bf16.mxu0 %v383_v55 }
  0x4a   :  { %354 = vmatpush1.bf16.xpose.msra.mxu1 %v353_v0 }
  0x4b   :  { %386 = vmatpush1.bf16.xpose.msra.mxu0 %v385_v1  ;;  %356 = vmatprep.subr.bf16.mxu1 %v355_v2 }
  0x4c   :  { %388 = vmatprep.subr.bf16.mxu0 %v387_v3 }
  0x52   :  { %358 = vmatpush1.bf16.xpose.msra.mxu1 %v357_v12 }
  0x53   :  { %390 = vmatpush1.bf16.xpose.msra.mxu0 %v389_v13  ;;  %360 = vmatprep.subr.bf16.mxu1 %v359_v14 }
  0x54   :  { %392 = vmatprep.subr.bf16.mxu0 %v391_v15 }
  0x5a   :  { %362 = vmatpush1.bf16.xpose.msra.mxu1 %v361_v24 }
  0x5b   :  { %394 = vmatpush1.bf16.xpose.msra.mxu0 %v393_v25  ;;  %364 = vmatprep.subr.bf16.mxu1 %v363_v26 }
  0x5c   :  { %396 = vmatprep.subr.bf16.mxu0 %v395_v27 }
  0x62   :  { %366 = vmatpush1.bf16.xpose.msra.mxu1 %v365_v32 }
  0x63   :  { %398 = vmatpush1.bf16.xpose.msra.mxu0 %v397_v33  ;;  %330 = vmatprep.subr.mxu1 %v458_v36 }
  0x69   :  { %173 = vmatmul.mubr.f32.vlgmr.msra.gmra.mrb[0].mxu1 %v40_v34 }
  0x6a   :  { %243 = vmatmul.mubr.f32.vlgmr.msra.gmra.mrb[0].mxu0 %v42_v35  ;;  %331 = vmatpush3.xpose.msra.mxu1 %v249_v37 }
  0x6b   :  { %332 = vmatprep.mubr.msk.f32.mxu1 %vm459_vm0, %v458_v36 }
 0x13c   :  { %v174_v38 = vpop.f32.mrb[0].mxu1 }
 0x13d   :  { %v244_v39 = vpop.f32.mrb[0].mxu0  ;;  %v176_v40 = vpop.f32.mrb[1].mxu1 }
 0x13e   :  { %v245_v41 = vadd.f32 %v244_v39, %v174_v38  ;;  %v246_v42 = vpop.f32.mrb[1].mxu0 }
 0x140   :  { %v248_v43 = vmax.f32 %v245_v41, 0.0 }
 0x142   :  { %333 = vmatmul.mubr.f32.vlgmr.msra.gmra.mrb[2].mxu1 %v248_v43 }
 0x215   :  { %v316_v44 = vpop.f32.mrb[2].mxu1 }
 0x216   :  { %321 = vst.msk [vmem:[%s520_s3] sm:$0xff] %vm320_vm1, %v316_v44  ;;  %v334_v45 = vpop.f32.mrb[3].mxu1 }
 0x217   :  { %326 = vsyncpa [#allocation3], 1 }
 0x218   :  { %327 = vsyncpa [#allocation5], 1 }

</bundles_post_ra>
